<compile_context>
chip_gen: v6e
topology: v6e:2x2x1
jax: 0.10.0
libtpu: 0.0.40
codegen_flags: <defaults>
</compile_context>

<pallas_src>
import functools

import jax
import jax.numpy as jnp
from jax.experimental import pallas as pl
from jax.experimental.pallas import tpu as pltpu

LANE = 128
BF16_ROW = 16   # bf16 sublane packing: keep weight-slab row offsets 16-aligned
F32_ROW = 8


def _round_up(x, m):
    return (x + m - 1) // m * m


def decoder_kernel(xcat_ref, state_ref, w_ref, b_ref, out_ref, *,
                   L, B, H, IN, KIH, TinP, RG, RW, OW):
    """Fused single-step stacked-LSTM decoder.

    w_ref  (bf16, rows x 128): rows [0,TinP) Wpre^T (cols [0,IN));
        per layer l: rows [RG+l*(KIH+H), +in_l) Wih_l^T and
        rows [RG+l*(KIH+H)+KIH, +H) Whh_l^T, gates densified at cols [k*H,(k+1)*H);
        rows [RW, RW+H) Wout^T (cols [0,out_size)).
    b_ref  (f32, rows x 128): row 0 b_pre, row 1 b_out, row 2+l gate biases.
    state_ref (f32, 2L*B x H): rows [l*B,+B) h0_l, rows [(L+l)*B,+B) c0_l.
    out_ref   (f32, (2L+1)*B x OW): h per layer, c per layer, pred (OW == H).
    """
    bf16 = jnp.bfloat16
    f32 = jnp.float32

    # ---- input projection: x0 = tanh([x | type_emb] @ Wpre^T + b_pre) ----
    wpre = w_ref[0:TinP, 0:IN]                          # (TinP, IN) bf16
    bpre = b_ref[0:1, 0:IN]                             # (1, IN)   f32
    x0 = jnp.tanh(
        jnp.dot(xcat_ref[...].astype(bf16), wpre,
                preferred_element_type=f32) + bpre)     # (B, IN)   f32

    h_new = None
    for l in range(L):                                  # statically unrolled, T = 1
        r0 = RG + l * (KIH + H)
        if l == 0:
            lhs = x0.astype(bf16)                       # (B, IN)
            wih = w_ref[r0:r0 + IN, :]                  # (IN, 4H)
        else:
            lhs = h_new.astype(bf16)                    # (B, H) previous layer output
            wih = w_ref[r0:r0 + H, :]                   # (H, 4H)
        whh = w_ref[r0 + KIH:r0 + KIH + H, :]           # (H, 4H)
        bg = b_ref[2 + l:3 + l, :]                      # (1, 4H) f32

        h_prev = state_ref[l * B:(l + 1) * B, :]              # (B, H) f32
        c_prev = state_ref[(L + l) * B:(L + l + 1) * B, :]    # (B, H) f32

        # Two single-tile MXU pushes into a shared f32 accumulator
        # (no VMEM store->load of a fused [x|h] operand on the critical path).
        gates = (jnp.dot(lhs, wih, preferred_element_type=f32)
                 + jnp.dot(h_prev.astype(bf16), whh, preferred_element_type=f32)
                 + bg)                                   # (B, 4H) f32

        # Full-width nonlinearities + static lane mask for the g gate
        # (gate order i, f, g, o; g occupies lanes [2H, 3H)).
        lane = jax.lax.broadcasted_iota(jnp.int32, gates.shape, 1)
        is_g = (lane >= 2 * H) & (lane < 3 * H)
        act = jnp.where(is_g, jnp.tanh(gates), jax.nn.sigmoid(gates))

        i_g = act[:, 0 * H:1 * H]
        f_g = act[:, 1 * H:2 * H]
        g_g = act[:, 2 * H:3 * H]
        o_g = act[:, 3 * H:4 * H]

        c_new = f_g * c_prev + i_g * g_g
        h_new = o_g * jnp.tanh(c_new)

        out_ref[l * B:(l + 1) * B, :] = h_new                   # OW == H: full-width
        out_ref[(L + l) * B:(L + l + 1) * B, :] = c_new

    # ---- output projection on the top layer's hidden state ----
    wout = w_ref[RW:RW + H, 0:OW]                       # (H, OW) bf16, zero-padded cols
    bout = b_ref[1:2, 0:OW]                             # (1, OW) f32, zero-padded cols
    out_ref[2 * L * B:2 * L * B + B, :] = (
        jnp.dot(h_new.astype(bf16), wout, preferred_element_type=f32) + bout)


def decoder_forward(xcat, state, wslab, bslab, *,
                    L, B, H, IN, KIH, TinP, RG, RW, OW, out_size):
    vmem = pl.BlockSpec(memory_space=pltpu.MemorySpace.VMEM)
    kern = functools.partial(decoder_kernel, L=L, B=B, H=H, IN=IN, KIH=KIH,
                             TinP=TinP, RG=RG, RW=RW, OW=OW)
    out = pl.pallas_call(
        kern,
        out_shape=jax.ShapeDtypeStruct(((2 * L + 1) * B, OW), jnp.float32),
        in_specs=[vmem, vmem, vmem, vmem],
        out_specs=vmem,
    )(xcat, state, wslab, bslab)
    h = out[0:L * B].reshape(L, B, OW)[:, :, :H]
    c = out[L * B:2 * L * B].reshape(L, B, OW)[:, :, :H]
    pred = out[2 * L * B:2 * L * B + B, :out_size]
    return pred, h, c


if __name__ == "__main__":
    # small shapes consistent with the module
    hidden_size = 32
    num_layers = 1
    output_size = 16                 # == input_size in the module
    batch_size = 2
    input_size = output_size
    type_dim = 8 + 6                 # the `8 + 6` in `_linear`
    L = num_layers * 2               # nn.LSTM(num_layers * num_directions), stacked
    H = hidden_size
    B = batch_size
    IN = input_size
    Tin = type_dim + input_size

    # out slab width equals H; the head's output columns are zero-padded to H.
    assert output_size <= hidden_size  # TODO(synk): widen out slab if ever violated

    GW = _round_up(4 * H, LANE)                 # densified gate width (128 for H=32)
    TinP = _round_up(Tin, BF16_ROW)             # padded _linear input width
    KIH = _round_up(max(IN, H), BF16_ROW)       # per-layer Wih row allocation
    RG = TinP                                   # first gate-weight row
    RW = RG + L * (KIH + H)                     # Wout^T row
    WR = _round_up(RW + H, BF16_ROW)            # weight-slab rows
    BR = _round_up(2 + L, F32_ROW)              # bias-slab rows
    OW = H                                      # output lane width (h/c/pred rows)

    key = jax.random.PRNGKey(0)
    keys = iter(jax.random.split(key, 32))
    scale = 0.1

    def rnd(shape):
        return scale * jax.random.normal(next(keys), shape, dtype=jnp.float32)

    # --- deterministic parameters (PyTorch shape conventions, gate order i,f,g,o) ---
    Wpre = rnd((IN, Tin))                        # _linear.weight
    bpre = rnd((IN,))                            # _linear.bias
    Wih = [rnd((4 * H, IN if l == 0 else H)) for l in range(L)]
    Whh = [rnd((4 * H, H)) for l in range(L)]
    bih = [rnd((4 * H,)) for l in range(L)]
    bhh = [rnd((4 * H,)) for l in range(L)]
    Wout = rnd((output_size, H))                 # linear.weight
    bout = rnd((output_size,))                   # linear.bias

    # --- inputs ---
    x = rnd((B, IN))                             # input_seq
    temb = rnd((B, type_dim))                    # type_emb
    h0 = rnd((L, B, H))
    c0 = rnd((L, B, H))

    # --- host-side packing (layout plumbing only; padding stays exactly 0) ---
    wslab = jnp.zeros((WR, GW), jnp.float32)
    wslab = wslab.at[0:Tin, 0:IN].set(Wpre.T)
    for l in range(L):
        in_l = IN if l == 0 else H
        r0 = RG + l * (KIH + H)
        wslab = wslab.at[r0:r0 + in_l, 0:4 * H].set(Wih[l].T)        # densified gates
        wslab = wslab.at[r0 + KIH:r0 + KIH + H, 0:4 * H].set(Whh[l].T)
    wslab = wslab.at[RW:RW + H, 0:output_size].set(Wout.T)
    wslab = wslab.astype(jnp.bfloat16)           # bf16 weights, f32 MXU accumulation

    bslab = jnp.zeros((BR, GW), jnp.float32)
    bslab = bslab.at[0, 0:IN].set(bpre)
    bslab = bslab.at[1, 0:output_size].set(bout)
    for l in range(L):
        bslab = bslab.at[2 + l, 0:4 * H].set(bih[l] + bhh[l])

    state = jnp.concatenate([h0.reshape(L * B, H), c0.reshape(L * B, H)], axis=0)
    xcat = jnp.concatenate([x, temb], axis=1)
    xcat = jnp.pad(xcat, ((0, 0), (0, TinP - Tin)))

    pred, h_out, c_out = decoder_forward(
        xcat, state, wslab, bslab,
        L=L, B=B, H=H, IN=IN, KIH=KIH, TinP=TinP, RG=RG, RW=RW, OW=OW,
        out_size=output_size)
    jax.block_until_ready((pred, h_out, c_out))

    # --- pure-JAX f32 reference mirroring the PyTorch forward ---
    hi = jax.lax.Precision.HIGHEST
    xin = jnp.concatenate([x, temb], axis=1)
    xi = jnp.tanh(jnp.dot(xin, Wpre.T, precision=hi) + bpre)
    layer_in = xi
    h_ref, c_ref = [], []
    for l in range(L):
        gates = (jnp.dot(layer_in, Wih[l].T, precision=hi) + bih[l]
                 + jnp.dot(h0[l], Whh[l].T, precision=hi) + bhh[l])
        i_g = jax.nn.sigmoid(gates[:, :H])
        f_g = jax.nn.sigmoid(gates[:, H:2 * H])
        g_g = jnp.tanh(gates[:, 2 * H:3 * H])
        o_g = jax.nn.sigmoid(gates[:, 3 * H:])
        c_n = f_g * c0[l] + i_g * g_g
        h_n = o_g * jnp.tanh(c_n)
        h_ref.append(h_n)
        c_ref.append(c_n)
        layer_in = h_n
    pred_ref = jnp.dot(layer_in, Wout.T, precision=hi) + bout

    # bf16 weight storage (f32 accumulation) -> slightly looser tolerance.
    tol = dict(atol=5e-3, rtol=5e-3)
    assert jnp.allclose(pred, pred_ref, **tol)
    assert jnp.allclose(h_out, jnp.stack(h_ref), **tol)
    assert jnp.allclose(c_out, jnp.stack(c_ref), **tol)
    print("KERNEL_OK")
</pallas_src>

<mosaic_0001>
module attributes {stable_mosaic.version = 11 : i64} {
  func.func @decoder_kernel(%arg0: memref<2x32xf32, #tpu.memory_space<vmem>>, %arg1: memref<8x32xf32, #tpu.memory_space<vmem>>, %arg2: memref<192x128xbf16, #tpu.memory_space<vmem>>, %arg3: memref<8x128xf32, #tpu.memory_space<vmem>>, %arg4: memref<10x32xf32, #tpu.memory_space<vmem>>) attributes {dimension_semantics = [], scalar_prefetch = 0 : i64, scratch_operands = 0 : i64, tpu.core_type = #tpu.core_type<tc>} {
    %c0 = arith.constant 0 : index
    %c0_0 = arith.constant 0 : index
    %0 = vector.load %arg2[%c0, %c0_0] : memref<192x128xbf16, #tpu.memory_space<vmem>>, vector<32x16xbf16>
    %c0_1 = arith.constant 0 : index
    %c0_2 = arith.constant 0 : index
    %1 = vector.load %arg3[%c0_1, %c0_2] : memref<8x128xf32, #tpu.memory_space<vmem>>, vector<1x16xf32>
    %c0_3 = arith.constant 0 : index
    %c0_4 = arith.constant 0 : index
    %2 = vector.load %arg0[%c0_3, %c0_4] : memref<2x32xf32, #tpu.memory_space<vmem>>, vector<2x32xf32>
    %3 = arith.truncf %2 : vector<2x32xf32> to vector<2x32xbf16>
    %cst = arith.constant dense<0.000000e+00> : vector<2x16xf32>
    %4 = tpu.matmul %3, %0, %cst {dimension_numbers = #tpu.dot_dimension_numbers<[1], [0], [0], [1], [0, 0, 1, 1], [], []>} : vector<2x32xbf16>, vector<32x16xbf16>, vector<2x16xf32> -> vector<2x16xf32>
    %5 = vector.broadcast %1 : vector<1x16xf32> to vector<2x16xf32>
    %6 = arith.addf %4, %5 : vector<2x16xf32>
    %7 = math.tanh %6 : vector<2x16xf32>
    %8 = arith.truncf %7 : vector<2x16xf32> to vector<2x16xbf16>
    %c32 = arith.constant 32 : index
    %c0_5 = arith.constant 0 : index
    %9 = vector.load %arg2[%c32, %c0_5] : memref<192x128xbf16, #tpu.memory_space<vmem>>, vector<16x128xbf16>
    %c64 = arith.constant 64 : index
    %c0_6 = arith.constant 0 : index
    %10 = vector.load %arg2[%c64, %c0_6] : memref<192x128xbf16, #tpu.memory_space<vmem>>, vector<32x128xbf16>
    %c2 = arith.constant 2 : index
    %c0_7 = arith.constant 0 : index
    %11 = vector.load %arg3[%c2, %c0_7] : memref<8x128xf32, #tpu.memory_space<vmem>>, vector<1x128xf32>
    %c0_8 = arith.constant 0 : index
    %c0_9 = arith.constant 0 : index
    %12 = vector.load %arg1[%c0_8, %c0_9] : memref<8x32xf32, #tpu.memory_space<vmem>>, vector<2x32xf32>
    %c4 = arith.constant 4 : index
    %c0_10 = arith.constant 0 : index
    %13 = vector.load %arg1[%c4, %c0_10] : memref<8x32xf32, #tpu.memory_space<vmem>>, vector<2x32xf32>
    %cst_11 = arith.constant dense<0.000000e+00> : vector<2x128xf32>
    %14 = tpu.matmul %8, %9, %cst_11 {dimension_numbers = #tpu.dot_dimension_numbers<[1], [0], [0], [1], [0, 0, 1, 1], [], []>} : vector<2x16xbf16>, vector<16x128xbf16>, vector<2x128xf32> -> vector<2x128xf32>
    %15 = arith.truncf %12 : vector<2x32xf32> to vector<2x32xbf16>
    %cst_12 = arith.constant dense<0.000000e+00> : vector<2x128xf32>
    %16 = tpu.matmul %15, %10, %cst_12 {dimension_numbers = #tpu.dot_dimension_numbers<[1], [0], [0], [1], [0, 0, 1, 1], [], []>} : vector<2x32xbf16>, vector<32x128xbf16>, vector<2x128xf32> -> vector<2x128xf32>
    %17 = arith.addf %14, %16 : vector<2x128xf32>
    %18 = vector.broadcast %11 : vector<1x128xf32> to vector<2x128xf32>
    %19 = arith.addf %17, %18 : vector<2x128xf32>
    %20 = tpu.iota {dimensions = array<i32: 1>} : vector<2x128xi32>
    %c64_i32 = arith.constant 64 : i32
    %21 = vector.broadcast %c64_i32 : i32 to vector<2x128xi32>
    %22 = arith.cmpi sge, %20, %21 : vector<2x128xi32>
    %c96_i32 = arith.constant 96 : i32
    %23 = vector.broadcast %c96_i32 : i32 to vector<2x128xi32>
    %24 = arith.cmpi slt, %20, %23 : vector<2x128xi32>
    %25 = arith.andi %22, %24 : vector<2x128xi1>
    %26 = math.tanh %19 : vector<2x128xf32>
    %27 = arith.negf %19 : vector<2x128xf32>
    %28 = math.exp %27 : vector<2x128xf32>
    %cst_13 = arith.constant 1.000000e+00 : f32
    %29 = vector.broadcast %cst_13 : f32 to vector<2x128xf32>
    %30 = arith.addf %29, %28 : vector<2x128xf32>
    %31 = arith.divf %29, %30 : vector<2x128xf32>
    %32 = arith.select %25, %26, %31 : vector<2x128xi1>, vector<2x128xf32>
    %33 = vector.extract_strided_slice %32 {offsets = [0, 0], sizes = [2, 32], strides = [1, 1]} : vector<2x128xf32> to vector<2x32xf32>
    %34 = vector.extract_strided_slice %32 {offsets = [0, 32], sizes = [2, 32], strides = [1, 1]} : vector<2x128xf32> to vector<2x32xf32>
    %35 = vector.extract_strided_slice %32 {offsets = [0, 64], sizes = [2, 32], strides = [1, 1]} : vector<2x128xf32> to vector<2x32xf32>
    %36 = vector.extract_strided_slice %32 {offsets = [0, 96], sizes = [2, 32], strides = [1, 1]} : vector<2x128xf32> to vector<2x32xf32>
    %37 = arith.mulf %34, %13 : vector<2x32xf32>
    %38 = arith.mulf %33, %35 : vector<2x32xf32>
    %39 = arith.addf %37, %38 : vector<2x32xf32>
    %40 = math.tanh %39 : vector<2x32xf32>
    %41 = arith.mulf %36, %40 : vector<2x32xf32>
    %c0_14 = arith.constant 0 : index
    %c0_15 = arith.constant 0 : index
    %42 = vector.load %arg4[%c0_14, %c0_15] : memref<10x32xf32, #tpu.memory_space<vmem>>, vector<2x32xf32>
    tpu.vector_store %arg4[%c0_14, %c0_15], %41 {strides = array<i32>} : memref<10x32xf32, #tpu.memory_space<vmem>>, vector<2x32xf32>,
    %c4_16 = arith.constant 4 : index
    %c0_17 = arith.constant 0 : index
    %43 = vector.load %arg4[%c4_16, %c0_17] : memref<10x32xf32, #tpu.memory_space<vmem>>, vector<2x32xf32>
    tpu.vector_store %arg4[%c4_16, %c0_17], %39 {strides = array<i32>} : memref<10x32xf32, #tpu.memory_space<vmem>>, vector<2x32xf32>,
    %44 = arith.truncf %41 : vector<2x32xf32> to vector<2x32xbf16>
    %c96 = arith.constant 96 : index
    %c0_18 = arith.constant 0 : index
    %45 = vector.load %arg2[%c96, %c0_18] : memref<192x128xbf16, #tpu.memory_space<vmem>>, vector<32x128xbf16>
    %c128 = arith.constant 128 : index
    %c0_19 = arith.constant 0 : index
    %46 = vector.load %arg2[%c128, %c0_19] : memref<192x128xbf16, #tpu.memory_space<vmem>>, vector<32x128xbf16>
    %c3 = arith.constant 3 : index
    %c0_20 = arith.constant 0 : index
    %47 = vector.load %arg3[%c3, %c0_20] : memref<8x128xf32, #tpu.memory_space<vmem>>, vector<1x128xf32>
    %c2_21 = arith.constant 2 : index
    %c0_22 = arith.constant 0 : index
    %48 = vector.load %arg1[%c2_21, %c0_22] : memref<8x32xf32, #tpu.memory_space<vmem>>, vector<2x32xf32>
    %c6 = arith.constant 6 : index
    %c0_23 = arith.constant 0 : index
    %49 = vector.load %arg1[%c6, %c0_23] : memref<8x32xf32, #tpu.memory_space<vmem>>, vector<2x32xf32>
    %cst_24 = arith.constant dense<0.000000e+00> : vector<2x128xf32>
    %50 = tpu.matmul %44, %45, %cst_24 {dimension_numbers = #tpu.dot_dimension_numbers<[1], [0], [0], [1], [0, 0, 1, 1], [], []>} : vector<2x32xbf16>, vector<32x128xbf16>, vector<2x128xf32> -> vector<2x128xf32>
    %51 = arith.truncf %48 : vector<2x32xf32> to vector<2x32xbf16>
    %cst_25 = arith.constant dense<0.000000e+00> : vector<2x128xf32>
    %52 = tpu.matmul %51, %46, %cst_25 {dimension_numbers = #tpu.dot_dimension_numbers<[1], [0], [0], [1], [0, 0, 1, 1], [], []>} : vector<2x32xbf16>, vector<32x128xbf16>, vector<2x128xf32> -> vector<2x128xf32>
    %53 = arith.addf %50, %52 : vector<2x128xf32>
    %54 = vector.broadcast %47 : vector<1x128xf32> to vector<2x128xf32>
    %55 = arith.addf %53, %54 : vector<2x128xf32>
    %56 = tpu.iota {dimensions = array<i32: 1>} : vector<2x128xi32>
    %c64_i32_26 = arith.constant 64 : i32
    %57 = vector.broadcast %c64_i32_26 : i32 to vector<2x128xi32>
    %58 = arith.cmpi sge, %56, %57 : vector<2x128xi32>
    %c96_i32_27 = arith.constant 96 : i32
    %59 = vector.broadcast %c96_i32_27 : i32 to vector<2x128xi32>
    %60 = arith.cmpi slt, %56, %59 : vector<2x128xi32>
    %61 = arith.andi %58, %60 : vector<2x128xi1>
    %62 = math.tanh %55 : vector<2x128xf32>
    %63 = arith.negf %55 : vector<2x128xf32>
    %64 = math.exp %63 : vector<2x128xf32>
    %cst_28 = arith.constant 1.000000e+00 : f32
    %65 = vector.broadcast %cst_28 : f32 to vector<2x128xf32>
    %66 = arith.addf %65, %64 : vector<2x128xf32>
    %67 = arith.divf %65, %66 : vector<2x128xf32>
    %68 = arith.select %61, %62, %67 : vector<2x128xi1>, vector<2x128xf32>
    %69 = vector.extract_strided_slice %68 {offsets = [0, 0], sizes = [2, 32], strides = [1, 1]} : vector<2x128xf32> to vector<2x32xf32>
    %70 = vector.extract_strided_slice %68 {offsets = [0, 32], sizes = [2, 32], strides = [1, 1]} : vector<2x128xf32> to vector<2x32xf32>
    %71 = vector.extract_strided_slice %68 {offsets = [0, 64], sizes = [2, 32], strides = [1, 1]} : vector<2x128xf32> to vector<2x32xf32>
    %72 = vector.extract_strided_slice %68 {offsets = [0, 96], sizes = [2, 32], strides = [1, 1]} : vector<2x128xf32> to vector<2x32xf32>
    %73 = arith.mulf %70, %49 : vector<2x32xf32>
    %74 = arith.mulf %69, %71 : vector<2x32xf32>
    %75 = arith.addf %73, %74 : vector<2x32xf32>
    %76 = math.tanh %75 : vector<2x32xf32>
    %77 = arith.mulf %72, %76 : vector<2x32xf32>
    %c2_29 = arith.constant 2 : index
    %c0_30 = arith.constant 0 : index
    %78 = vector.load %arg4[%c2_29, %c0_30] : memref<10x32xf32, #tpu.memory_space<vmem>>, vector<2x32xf32>
    tpu.vector_store %arg4[%c2_29, %c0_30], %77 {strides = array<i32>} : memref<10x32xf32, #tpu.memory_space<vmem>>, vector<2x32xf32>,
    %c6_31 = arith.constant 6 : index
    %c0_32 = arith.constant 0 : index
    %79 = vector.load %arg4[%c6_31, %c0_32] : memref<10x32xf32, #tpu.memory_space<vmem>>, vector<2x32xf32>
    tpu.vector_store %arg4[%c6_31, %c0_32], %75 {strides = array<i32>} : memref<10x32xf32, #tpu.memory_space<vmem>>, vector<2x32xf32>,
    %c160 = arith.constant 160 : index
    %c0_33 = arith.constant 0 : index
    %80 = vector.load %arg2[%c160, %c0_33] : memref<192x128xbf16, #tpu.memory_space<vmem>>, vector<32x32xbf16>
    %c1 = arith.constant 1 : index
    %c0_34 = arith.constant 0 : index
    %81 = vector.load %arg3[%c1, %c0_34] : memref<8x128xf32, #tpu.memory_space<vmem>>, vector<1x32xf32>
    %82 = arith.truncf %77 : vector<2x32xf32> to vector<2x32xbf16>
    %cst_35 = arith.constant dense<0.000000e+00> : vector<2x32xf32>
    %83 = tpu.matmul %82, %80, %cst_35 {dimension_numbers = #tpu.dot_dimension_numbers<[1], [0], [0], [1], [0, 0, 1, 1], [], []>} : vector<2x32xbf16>, vector<32x32xbf16>, vector<2x32xf32> -> vector<2x32xf32>
    %84 = vector.broadcast %81 : vector<1x32xf32> to vector<2x32xf32>
    %85 = arith.addf %83, %84 : vector<2x32xf32>
    %c8 = arith.constant 8 : index
    %c0_36 = arith.constant 0 : index
    %86 = vector.load %arg4[%c8, %c0_36] : memref<10x32xf32, #tpu.memory_space<vmem>>, vector<2x32xf32>
    tpu.vector_store %arg4[%c8, %c0_36], %85 {strides = array<i32>} : memref<10x32xf32, #tpu.memory_space<vmem>>, vector<2x32xf32>,
    return
  }
}

</mosaic_0001>

<bundles_post_ra>
// kernel: tpu_custom_call.1
= control target key start
LH: loop header
LB: loop body
LE: loop exit
PB: predicated region body
PF: predicated region fallthrough
CT: control target
= control target key end

     0   :  { %9 = vsyncpa [#allocation3], 0  ;;  %s908_s0 = inlined_call_operand.hbm [shape: f32[2,32], index: 0, kind: input, shape index: {}]   ;;  %s909_s1 = inlined_call_operand.hbm [shape: f32[8,32], index: 1, kind: input, shape index: {}]   ;;  %s910_s2 = inlined_call_operand.hbm [shape: bf16[192,128], index: 2, kind: input, shape index: {}]   ;;  %s911_s3 = inlined_call_operand.hbm [shape: f32[8,128], index: 3, kind: input, shape index: {}]   ;;  %s912_s4 = inlined_call_operand.hbm [shape: f32[10,32], index: 4, kind: output, shape index: {}]  }
   0x1   :  { %10 = vsyncpa [#allocation6], 0 }
   0x2   :  { %11 = vsyncpa [#allocation9], 0 }
   0x3   :  { %12 = vsyncpa [#allocation4], 0  ;;  %s796_s15 = smov [#allocation5]   ;;  %s797_s17 = smov [#allocation2]  }
   0x4   :  { %s29_s16 = sshll.u32 %s796_s15, 4  ;;  %s19_s18 = sshll.u32 %s797_s17, 4  ;;  %s30_s16 = int_to_ptr.vmem [resolvable:$true] %s29_s16  ;;  %s20_s18 = int_to_ptr.vmem [resolvable:$true] %s19_s18 }
   0x5   :  { %s696_s19 = scalar_lea.vmem %s30_s16, 128  ;;  %p701_p1 = scmp.lt.s32.totalorder %s30_s16, %s30_s16 }
   0x6   :  { %p697_p0 = scmp.ne.s32.totalorder %s30_s16, %s696_s19  ;;  %p702_p2 = scmp.lt.s32.totalorder %s696_s19, %s696_s19 }
   0x8   :  { %p703_p3 = por %p702_p2, %p701_p1 }
   0xa   :  { %p704_p4 = pnand %p703_p3, %p697_p0 }
   0xc   :  { %707 = shalt.err (!%p704_p4)
}
   0xd   :  { %32 = dma.hbm_to_vmem [thread:$0]  %s909_s1, 128, %s30_s16, [#allocation6]  }
   0xe   :  { %s716_s22 = scalar_lea.vmem %s20_s18, 32  ;;  %p721_p6 = scmp.lt.s32.totalorder %s20_s18, %s20_s18 }
   0xf   :  { %p717_p5 = scmp.ne.s32.totalorder %s20_s18, %s716_s22  ;;  %p722_p7 = scmp.lt.s32.totalorder %s716_s22, %s716_s22 }
  0x11   :  { %p723_p8 = por %p722_p7, %p721_p6 }
  0x13   :  { %p724_p9 = pnand %p723_p8, %p717_p5 }
  0x15   :  { %727 = shalt.err (!%p724_p9)
}
  0x16   :  { %22 = dma.hbm_to_vmem [thread:$0]  %s908_s0, 32, %s20_s18, [#allocation3]  }
  0x17   :  { %s798_s25 = smov [#allocation7]  }
  0x18   :  { %s38_s26 = sshll.u32 %s798_s25, 4  ;;  %s39_s26 = int_to_ptr.vmem [resolvable:$true] %s38_s26 }
  0x19   :  { %s736_s27 = scalar_lea.vmem %s39_s26, 1536  ;;  %p741_p11 = scmp.lt.s32.totalorder %s39_s26, %s39_s26 }
  0x1a   :  { %p737_p10 = scmp.ne.s32.totalorder %s39_s26, %s736_s27  ;;  %p742_p12 = scmp.lt.s32.totalorder %s736_s27, %s736_s27 }
  0x1c   :  { %p743_p13 = por %p742_p12, %p741_p11 }
  0x1e   :  { %p744_p0 = pnand %p743_p13, %p737_p10 }
  0x20   :  { %747 = shalt.err (!%p744_p0)
}
  0x21   :  { %s799_s1 = smov 64   ;;  %s800_s28 = smov 4  }
  0x22   :  { %44 = dma.hbm_to_vmem [thread:$0]  %s910_s2, 1536, %s39_s26, [#allocation6], %s799_s1, %s799_s1, %s800_s28  }
  0x23   :  { %s801_s5 = smov [#allocation8]  }
  0x24   :  { %s51_s0 = sshll.u32 %s801_s5, 4  ;;  %s52_s0 = int_to_ptr.vmem [resolvable:$true] %s51_s0 }
  0x25   :  { %s756_s6 = scalar_lea.vmem %s52_s0, 128  ;;  %p761_p2 = scmp.lt.s32.totalorder %s52_s0, %s52_s0 }
  0x26   :  { %p757_p1 = scmp.ne.s32.totalorder %s52_s0, %s756_s6  ;;  %p762_p3 = scmp.lt.s32.totalorder %s756_s6, %s756_s6 }
  0x28   :  { %p763_p4 = por %p762_p3, %p761_p2 }
  0x2a   :  { %p764_p5 = pnand %p763_p4, %p757_p1 }
  0x2c   :  { %767 = shalt.err (!%p764_p5)
}
  0x2d   :  { %54 = dma.hbm_to_vmem [thread:$0]  %s911_s3, 128, %s52_s0, [#allocation9]  }
  0x2e   :  { %788 = dma.done.wait [#allocation3], 32  }
  0x2f   :  { %789 = vsyncadd [#allocation3], 4294967264 }
  0x30   :  { %790 = dma.done.wait [#allocation6], 1664  }
  0x31   :  { %791 = vsyncadd [#allocation6], 4294965632 }
  0x32   :  { %792 = dma.done.wait [#allocation9], 128  }
  0x33   :  { %793 = vsyncadd [#allocation9], 4294967168  ;;  %v802_v0 = vmov 0.0   ;;  %vm803_vm0 = vmmov 0   ;;  %v659_v1 = vld [vmem:[#allocation7 + $0x8] sm:$0xff]   ;;  %v660_v2 = vld [vmem:[#allocation7] sm:$0xff]   ;;  %v257_v32 = vlaneseq }
  0x34   :  { %600 = vmatprep.subr.bf16.mxu0 %v802_v0  ;;  %604 = vmatprep.mubr.msk.bf16.mxu0 %vm803_vm0, %v802_v0  ;;  %v73_v3 = vld [vmem:[#allocation2] sm:$0x3]  ;;  %vm91_vm1 = vcmask 261120   ;;  %v661_v5 = vld [vmem:[#allocation7 + $0x28] sm:$0xff]   ;;  %v662_v6 = vld [vmem:[#allocation7 + $0x20] sm:$0xff]   ;;  %vm208_vm2 = vcmask 130048  }
  0x35   :  { %608 = vmatprep.subr.bf16.mxu1 %v802_v0  ;;  %612 = vmatprep.mubr.msk.bf16.mxu1 %vm803_vm0, %v802_v0  ;;  %v74_v4 = vpack.c.bf16 %v73_v3, %v73_v3  ;;  %v144_v7 = vld [vmem:[#allocation5] sm:$0x3]  ;;  %v663_v9 = vld [vmem:[#allocation7 + $0x10] sm:$0xff]   ;;  %v560_v10 = vld [vmem:[#allocation8] ss:$0 sm:$0xff]  ;;  %v258_v33 = vand.u32 127, %v257_v32 }
  0x36   :  { %601 = vmatpush3.bf16.msra.mxu0 %v659_v1  ;;  %609 = vmatpush3.bf16.msra.mxu1 %v661_v5  ;;  %v146_v8 = vpack.c.bf16 %v144_v7, %v144_v7  ;;  %v569_v22 = vld [vmem:[#allocation8 + $0x2] ss:$0 sm:$0xff]  ;;  %v145_v38 = vld [vmem:[#allocation5 + $0x4] sm:$0x3]  ;;  %s804_s2 = smov 32   ;;  %v664_v45 = vld [vmem:[#allocation7 + $0x48] sm:$0xff]  }
  0x37   :  { %602 = vmatprep.subr.bf16.mxu0 %v802_v0  ;;  %610 = vmatprep.subr.bf16.mxu1 %v802_v0  ;;  %vm259_vm3 = vcmp.ge.s32.totalorder %v258_v33, 64  ;;  %vm260_vm4 = vcmp.lt.s32.totalorder %v258_v33, 96  ;;  %v666_v46 = vld [vmem:[#allocation7 + $0x38] sm:$0xff]   ;;  %v665_v47 = vld [vmem:[#allocation7 + $0x40] sm:$0xff]   ;;  %v667_v49 = vld [vmem:[#allocation7 + $0x30] sm:$0xff]   ;;  %vm295_vm6 = vcmask 254976  }
  0x38   :  { %vm867_vm5 = vmand %vm259_vm3, %vm260_vm4  ;;  %v312_v48 = vld [vmem:[#allocation5 + $0x2] sm:$0x3]  ;;  %v313_v55 = vld [vmem:[#allocation5 + $0x6] sm:$0x3]  ;;  %s805_s3 = smov 96   ;;  %s806_s9 = smov [#allocation10]  }
  0x39   :  { %v314_v50 = vpack.c.bf16 %v312_v48, %v312_v48  ;;  %v577_v61 = vld [vmem:[#allocation8 + $0x3] ss:$0 sm:$0xff]  ;;  %s546_s10 = sshll.u32 %s806_s9, 4  ;;  %s547_s10 = int_to_ptr.vmem [resolvable:$true] %s546_s10 }
  0x3a   :  { %603 = vmatpush3.bf16.msra.mxu0 %v660_v2  ;;  %611 = vmatpush3.bf16.msra.mxu1 %v662_v6  ;;  %s768_s11 = scalar_lea.vmem %s547_s10, 256  ;;  %p773_p7 = scmp.lt.s32.totalorder %s547_s10, %s547_s10 }
  0x3b   :  { %616 = vmatprep.subr.bf16.mxu0 %v802_v0  ;;  %622 = vmatprep.subr.bf16.mxu1 %v802_v0  ;;  %p769_p6 = scmp.ne.s32.totalorder %s547_s10, %s768_s11  ;;  %p774_p8 = scmp.lt.s32.totalorder %s768_s11, %s768_s11 }
  0x3d   :  { %605 = vmatmul.mubr.msk.bf16.vlgmr.msra.gmra.mxu0 %vm91_vm1, %v74_v4  ;;  %613 = vmatmul.mubr.msk.bf16.vlgmr.msra.gmra.mxu1 %vm91_vm1, %v146_v8  ;;  %p775_p9 = por %p774_p8, %p773_p7 }
  0x3e   :  { %618 = vmatprep.mubr.msk.bf16.mxu0 %vm803_vm0, %v802_v0  ;;  %626 = vmatprep.mubr.msk.bf16.mxu1 %vm803_vm0, %v802_v0 }
  0x3f   :  { %617 = vmatpush3.bf16.msra.mxu0 %v663_v9  ;;  %623 = vmatpush3.bf16.msra.mxu1 %v664_v45  ;;  %p776_p10 = pnand %p775_p9, %p769_p6 }
  0x40   :  { %630 = vmatprep.subr.bf16.mxu0 %v802_v0  ;;  %624 = vmatprep.subr.bf16.mxu1 %v802_v0 }
  0x43   :  { %625 = vmatpush3.bf16.msra.mxu1 %v665_v47 }
  0x44   :  { %638 = vmatprep.subr.bf16.mxu1 %v802_v0 }
  0x46   :  { %627 = vmatmul.mubr.msk.bf16.vlgmr.msra.gmra.mxu1 %vm91_vm1, %v314_v50 }
  0x47   :  { %642 = vmatprep.mubr.msk.bf16.mxu1 %vm803_vm0, %v802_v0 }
  0xfd   :  { %v129_v11 = vpop.f32.mrf.mxu0  ;;  %v196_v18 = vpop.f32.mrf.mxu1 }
  0xfe   :  { %v130_v12 = vadd.f32 %v560_v10, %v129_v11 }
  0xff   :  { %v606_v13 = vpop.f32.mrf.mxu0  ;;  %v614_v19 = vpop.f32.mrf.mxu1 }
 0x100   :  { %670 = vtanh.f32 %v130_v12  ;;  %v669_v19 = vld [vmem:[#allocation7 + $0x50] sm:$0xff]  }
 0x101   :  { %v132_v14 = vpop.f32.mrf.mxu0  ;;  %v199_v20 = vpop.f32.mrf.mxu1 }
 0x103   :  { %v607_v15 = vpop.f32.mrf.mxu0  ;;  %v615_v21 = vpop.f32.mrf.mxu1 }
 0x106   :  { %v364_v56 = vpop.f32.mrf.mxu1 }
 0x108   :  { %v628_v57 = vpop.f32.mrf.mxu1 }
 0x10a   :  { %v367_v58 = vpop.f32.mrf.mxu1 }
 0x10c   :  { %v629_v59 = vpop.f32.mrf.mxu1 }
 0x10d   :  { %v671_v16 = vpop.eup %670 }
 0x10e   :  { %v136_v17 = vpack.c.bf16 %v671_v16, %v671_v16 }
 0x110   :  { %619 = vmatmul.mubr.msk.bf16.vlgmr.msra.gmra.mxu0 %vm208_vm2, %v136_v17 }
 0x111   :  { %634 = vmatprep.mubr.msk.bf16.mxu0 %vm803_vm0, %v802_v0  ;;  %631 = vmatpush3.bf16.msra.mxu0 %v666_v46 }
 0x112   :  { %632 = vmatprep.subr.bf16.mxu0 %v802_v0 }
 0x115   :  { %633 = vmatpush3.bf16.msra.mxu0 %v667_v49 }
 0x1d0   :  { %v246_v23 = vpop.f32.mrf.mxu0 }
 0x1d1   :  { %v247_v24 = vadd.f32 %v246_v23, %v196_v18  ;;  %v668_v18 = vld [vmem:[#allocation7 + $0x58] sm:$0xff]  }
 0x1d2   :  { %v620_v25 = vpop.f32.mrf.mxu0  ;;  %639 = vmatpush3.bf16.msra.mxu1 %v668_v18 }
 0x1d3   :  { %v256_v26 = vadd.f32 %v569_v22, %v247_v24  ;;  %640 = vmatprep.subr.bf16.mxu1 %v802_v0 }
 0x1d4   :  { %v249_v27 = vpop.f32.mrf.mxu0 }
 0x1d5   :  { %v570_v28 = vmul.f32 -1.442695, %v256_v26  ;;  %v579_v27 = vld [vmem:[#allocation8 + $0x1] ss:$0 sm:$0xff] }
 0x1d6   :  { %v621_v29 = vpop.f32.mrf.mxu0  ;;  %641 = vmatpush3.bf16.msra.mxu1 %v669_v19 }
 0x1d7   :  { %672 = vpow2.f32 %v570_v28 }
 0x1d8   :  { %674 = vtanh.f32 %v256_v26 }
 0x1e4   :  { %v673_v30 = vpop.eup %672 }
 0x1e5   :  { %v266_v31 = vadd.f32 1.0, %v673_v30  ;;  %v675_v35 = vpop.eup %674 }
 0x1e7   :  { %676 = vrcp.f32 %v266_v31 }
 0x1f4   :  { %v677_v36 = vpop.eup %676 }
 0x1f5   :  { %v269_v37 = vsel %vm867_vm5, %v675_v35, %v677_v36 }
 0x1f6   :  { %276 = vrot.lane.b32.xlu0 %v269_v37, %s799_s1 }
 0x1fa   :  { %271 = vrot.lane.b32.xlu0 %v145_v38, %s804_s2 }
 0x268   :  { %v277_v39 = vpop.permute.xlu0 %276 }
 0x269   :  { %v279_v40 = vmul.f32 %v277_v39, %v269_v37 }
 0x26b   :  { %281 = vrot.lane.b32.xlu1 %v279_v40, %s804_s2 }
 0x26c   :  { %v272_v41 = vpop.permute.xlu0 %271 }
 0x26d   :  { %v274_v42 = vmul.f32 %v272_v41, %v269_v37 }
 0x2dd   :  { %v282_v43 = vpop.permute.xlu1 %281 }
 0x2de   :  { %v876_v44 = vadd.f32 %v282_v43, %v274_v42 }
 0x2e0   :  { %678 = vtanh.f32 %v876_v44 }
 0x2ed   :  { %v679_v51 = vpop.eup %678 }
 0x2ee   :  { %287 = vrot.lane.b32.xlu1 %v679_v51, %s799_s1 }
 0x360   :  { %v288_v52 = vpop.permute.xlu1 %287 }
 0x361   :  { %v290_v53 = vmul.f32 %v288_v52, %v269_v37 }
 0x363   :  { %v302_v54 = vpack.c.bf16 %v290_v53, %v290_v53 }
 0x365   :  { %371 = vrot.lane.b32.xlu0 %v302_v54, %s804_s2 }
 0x369   :  { %442 = vrot.lane.b32.xlu0 %v313_v55, %s804_s2 }
 0x3d7   :  { %v372_v60 = vpop.permute.xlu0 %371 }
 0x3d8   :  { %635 = vmatmul.mubr.msk.bf16.vlgmr.msra.gmra.mxu0 %vm91_vm1, %v372_v60 }
 0x3db   :  { %v443_v13 = vpop.permute.xlu0 %442 }
 0x498   :  { %v422_v62 = vpop.f32.mrf.mxu0 }
 0x499   :  { %v423_v63 = vadd.f32 %v422_v62, %v364_v56 }
 0x49a   :  { %v636_v1 = vpop.f32.mrf.mxu0 }
 0x49b   :  { %v432_v2 = vadd.f32 %v577_v61, %v423_v63 }
 0x49c   :  { %v425_v3 = vpop.f32.mrf.mxu0 }
 0x49d   :  { %v578_v4 = vmul.f32 -1.442695, %v432_v2 }
 0x49e   :  { %v637_v5 = vpop.f32.mrf.mxu0 }
 0x49f   :  { %680 = vpow2.f32 %v578_v4 }
 0x4a0   :  { %682 = vtanh.f32 %v432_v2 }
 0x4ac   :  { %v681_v6 = vpop.eup %680 }
 0x4ad   :  { %v437_v7 = vadd.f32 1.0, %v681_v6  ;;  %v683_v8 = vpop.eup %682 }
 0x4af   :  { %684 = vrcp.f32 %v437_v7 }
 0x4bc   :  { %v685_v9 = vpop.eup %684 }
 0x4bd   :  { %v440_v10 = vsel %vm867_vm5, %v683_v8, %v685_v9 }
 0x4be   :  { %447 = vrot.lane.b32.xlu1 %v440_v10, %s799_s1  ;;  %v445_v14 = vmul.f32 %v443_v13, %v440_v10 }
 0x530   :  { %v448_v11 = vpop.permute.xlu1 %447 }
 0x531   :  { %v450_v12 = vmul.f32 %v448_v11, %v440_v10 }
 0x533   :  { %452 = vrot.lane.b32.xlu1 %v450_v12, %s804_s2 }
 0x5a5   :  { %v453_v15 = vpop.permute.xlu1 %452 }
 0x5a6   :  { %v455_v16 = vadd.f32 %v453_v15, %v445_v14 }
 0x5a8   :  { %686 = vtanh.f32 %v455_v16 }
 0x5b5   :  { %v687_v17 = vpop.eup %686 }
 0x5b6   :  { %458 = vrot.lane.b32.xlu0 %v687_v17, %s799_s1 }
 0x5ba   :  { %292 = vrot.lane.b32.xlu0 %v290_v53, %s804_s2 }
 0x628   :  { %v459_v20 = vpop.permute.xlu0 %458 }
 0x629   :  { %v461_v21 = vmul.f32 %v459_v20, %v440_v10 }
 0x62b   :  { %v477_v22 = vpack.c.bf16 %v461_v21, %v461_v21  ;;  %463 = vrot.lane.b32.xlu0 %v461_v21, %s804_s2 }
 0x62c   :  { %v293_v23 = vpop.permute.xlu0 %292 }
 0x62d   :  { %296 = vst.msk [vmem:[#allocation10] sm:$0x3] %vm295_vm6, %v293_v23  ;;  %483 = vrot.lane.b32.xlu1 %v477_v22, %s804_s2 }
 0x631   :  { %298 = vrot.lane.b32.xlu1 %v876_v44, %s805_s3 }
 0x635   :  { %468 = vrot.lane.b32.xlu1 %v455_v16, %s805_s3 }
 0x69d   :  { %v464_v24 = vpop.permute.xlu0 %463 }
 0x69e   :  { %466 = vst.msk [vmem:[#allocation10 + $0x2] sm:$0x3] %vm295_vm6, %v464_v24 }
 0x69f   :  { %v484_v0 = vpop.permute.xlu1 %483 }
 0x6a0   :  { %643 = vmatmul.mubr.msk.bf16.vlgmr.msra.gmra.mxu1 %vm91_vm1, %v484_v0 }
 0x6a3   :  { %v299_v25 = vpop.permute.xlu1 %298 }
 0x6a4   :  { %301 = vst.msk [vmem:[#allocation10 + $0x4] sm:$0x3] %vm295_vm6, %v299_v25 }
 0x6a7   :  { %v469_v26 = vpop.permute.xlu1 %468 }
 0x6a8   :  { %471 = vst.msk [vmem:[#allocation10 + $0x6] sm:$0x3] %vm295_vm6, %v469_v26 }
 0x760   :  { %v534_v28 = vpop.f32.mrf.mxu1 }
 0x761   :  { %v535_v29 = vadd.f32 %v579_v27, %v534_v28 }
 0x762   :  { %v644_v30 = vpop.f32.mrf.mxu1 }
 0x763   :  { %540 = vst.msk [vmem:[#allocation10 + $0x8] sm:$0x3] %vm295_vm6, %v535_v29 }
 0x764   :  { %v537_v31 = vpop.f32.mrf.mxu1 }
 0x765   :  { %779 = shalt.err (!%p776_p10)
}
 0x766   :  { %s807_s12 = smov 128   ;;  %s808_s13 = smov 8   ;;  %v645_v32 = vpop.f32.mrf.mxu1 }
 0x767   :  { %552 = dma.vmem_to_hbm [thread:$0]  %s547_s10, 256, %s912_s4, [#allocation4], %s807_s12, %s807_s12, %s808_s13  }
 0x768   :  { %794 = dma.done.wait [#allocation4], 256  }
 0x769   :  { %795 = vsyncadd [#allocation4], 4294967040 }
 0x76a   :  { %556 = vsyncpa [#allocation3], 1 }
 0x76b   :  { %557 = vsyncpa [#allocation6], 1 }
 0x76c   :  { %558 = vsyncpa [#allocation9], 1 }
 0x76d   :  { %559 = vsyncpa [#allocation4], 1 }

</bundles_post_ra>
